<compile_context>
chip_gen: v7x
topology: tpu7x:2x2x1
jax: 0.10.0
libtpu: 0.0.40
codegen_flags: <defaults>
</compile_context>

<pallas_src>
import jax
import jax.numpy as jnp
from jax.experimental import pallas as pl
from jax.experimental.pallas import tpu as pltpu


# ----------------------------- kernels ------------------------------------ #

def _se_kernel_chw(x_ref, w1t_ref, w2t_ref, o_ref):
    # x_ref: (Bt, C, HW)  -- channels on sublanes, spatial on lanes.
    x = x_ref[...]
    # Squeeze: global average pool over spatial, f32 accumulation.
    pooled = jnp.mean(x, axis=-1, dtype=jnp.float32)                 # (Bt, C)
    # Excite: two small batched GEMMs (f32) + ReLU + sigmoid.
    h = jnp.maximum(
        jnp.dot(pooled, w1t_ref[...], preferred_element_type=jnp.float32), 0.0)
    s = jax.nn.sigmoid(
        jnp.dot(h, w2t_ref[...], preferred_element_type=jnp.float32))  # (Bt, C)
    # Rescale: f32 scale broadcast against activation-dtype data; the promote
    # is fused per-vreg with the store cast (no full-slab f32 temp).
    o_ref[...] = (x * s[:, :, None]).astype(o_ref.dtype)


def _se_kernel_hwc(x_ref, w1t_ref, w2t_ref, o_ref):
    # x_ref: (Bt, HW, C)  -- spatial on sublanes, channels on lanes
    # (lane-dense path for small-HW / large-C SE stages).
    x = x_ref[...]
    pooled = jnp.mean(x, axis=-2, dtype=jnp.float32)                 # (Bt, C)
    h = jnp.maximum(
        jnp.dot(pooled, w1t_ref[...], preferred_element_type=jnp.float32), 0.0)
    s = jax.nn.sigmoid(
        jnp.dot(h, w2t_ref[...], preferred_element_type=jnp.float32))  # (Bt, C)
    o_ref[...] = (x * s[:, None, :]).astype(o_ref.dtype)


# ----------------------------- sizing helpers ------------------------------ #

def _vmem_limit_bytes():
    """Generation-aware scoped-VMEM limit with headroom for internal scratch."""
    cap = None
    try:
        cap = getattr(pltpu.get_tpu_info(), "vmem_capacity_bytes", None)
    except Exception:
        cap = None
    if not cap:
        cap = 64 * 1024 * 1024          # conservative default: v7x per-TC VMEM
    cap = int(cap)
    limit = min(cap * 3 // 4, cap - (16 << 20))   # 48 MiB on v7x, 96 on v5e/v6e
    return max(limit, 32 << 20)


def _block_target_bytes(vmem_limit, weight_bytes):
    # Input block and output block are each double-buffered -> ~4x block bytes
    # live, plus resident weights and compiler-internal scratch margin.
    return max(1 << 20, (vmem_limit - weight_bytes - (4 << 20)) // 4)


def _pick_batch_block(B, bytes_per_image, target_bytes, min_grid_steps=8):
    """Largest Bt whose x block stays under target_bytes while keeping enough
    grid steps for pipelining / megacore sharding."""
    bt = max(1, min(B, target_bytes // max(bytes_per_image, 1)))
    if B >= min_grid_steps:
        bt = min(bt, max(1, B // min_grid_steps))
    else:
        bt = 1                              # one image per step -> B steps
    return int(bt)


# ----------------------------- wrapper ------------------------------------- #

def se_layer(x, w1, w2, *, min_grid_steps=8):
    """x: (B, C, H, W); w1: (C//r, C); w2: (C, C//r)  (PyTorch Linear layout)."""
    B, C, H, W = x.shape
    HW = H * W
    hid = w1.shape[0]
    assert w1.shape == (hid, C) and w2.shape == (C, hid)

    w1t = jnp.transpose(w1)                 # (C, hid) -- tiny, one-time
    w2t = jnp.transpose(w2)                 # (hid, C)
    w_bytes = int(w1.size * w1.dtype.itemsize + w2.size * w2.dtype.itemsize)

    vmem_limit = _vmem_limit_bytes()
    target = _block_target_bytes(vmem_limit, w_bytes)
    bt = _pick_batch_block(B, C * HW * x.dtype.itemsize, target, min_grid_steps)
    grid = (pl.cdiv(B, bt),)                # ragged last block is fine: rows
                                            # are independent, padded writes
                                            # are masked by Pallas.

    # Lane-dense layout choice: keep the free (B, C, HW) view when HW is the
    # 128-aligned axis; go (B, HW, C) when HW < 128 lanes but C is 128-aligned.
    use_hwc = (C % 128 == 0) and (HW % 128 != 0)
    if use_hwc:
        # TODO(synk): pick this layout upstream to avoid the wrapper transpose.
        x3 = jnp.transpose(x.reshape(B, C, HW), (0, 2, 1))   # (B, HW, C)
        kernel, blk = _se_kernel_hwc, (bt, HW, C)
    else:
        x3 = x.reshape(B, C, HW)                             # free view
        kernel, blk = _se_kernel_chw, (bt, C, HW)

    out3 = pl.pallas_call(
        kernel,
        out_shape=jax.ShapeDtypeStruct(x3.shape, x.dtype),
        grid_spec=pltpu.PrefetchScalarGridSpec(
            num_scalar_prefetch=0,
            grid=grid,
            in_specs=[
                pl.BlockSpec(blk, lambda b: (b, 0, 0)),
                pl.BlockSpec(w1t.shape, lambda b: (0, 0)),   # resident weights
                pl.BlockSpec(w2t.shape, lambda b: (0, 0)),
            ],
            out_specs=pl.BlockSpec(blk, lambda b: (b, 0, 0)),
        ),
        compiler_params=pltpu.CompilerParams(
            dimension_semantics=("parallel",),
            vmem_limit_bytes=int(vmem_limit),
        ),
        cost_estimate=pl.CostEstimate(
            flops=int(2 * B * C * hid * 2 + 2 * B * C * HW),
            transcendentals=int(B * C),
            bytes_accessed=int(2 * x.size * x.dtype.itemsize + w_bytes),
        ),
    )(x3, w1t, w2t)

    if use_hwc:
        return jnp.transpose(out3, (0, 2, 1)).reshape(B, C, H, W)
    return out3.reshape(B, C, H, W)


def se_layer_ref(x, w1, w2):
    """Pure-JAX reference matching the PyTorch forward (f32 math)."""
    xf = x.astype(jnp.float32)
    y = jnp.mean(xf, axis=(2, 3))                     # (B, C)
    y = jnp.maximum(y @ w1.T.astype(jnp.float32), 0.0)
    y = jax.nn.sigmoid(y @ w2.T.astype(jnp.float32))  # (B, C)
    return (xf * y[:, :, None, None]).astype(x.dtype)


# ----------------------------- demo / test --------------------------------- #

if __name__ == "__main__":
    key = jax.random.PRNGKey(0)
    k_x, k_w1, k_w2, k_x2, k_w3, k_w4 = jax.random.split(key, 6)
    reduction = 16

    # Config 1: lane-dense spatial path (HW = 256, multiple of 128), f32.
    B, C, H, W = 4, 64, 16, 16
    hid = C // reduction
    x = jax.random.normal(k_x, (B, C, H, W), dtype=jnp.float32)
    w1 = jax.random.normal(k_w1, (hid, C), dtype=jnp.float32) * 0.1
    w2 = jax.random.normal(k_w2, (C, hid), dtype=jnp.float32) * 0.1

    out = jax.block_until_ready(se_layer(x, w1, w2))
    ref = jax.block_until_ready(se_layer_ref(x, w1, w2))
    assert out.shape == (B, C, H, W)
    assert jnp.allclose(out, ref, atol=1e-4, rtol=1e-4), "mismatch (config 1)"

    # Config 2: small spatial, lane-dense channel path (HW=64 < 128, C=128).
    B2, C2, H2, W2 = 2, 128, 8, 8
    hid2 = C2 // reduction
    x2 = jax.random.normal(k_x2, (B2, C2, H2, W2), dtype=jnp.float32)
    w3 = jax.random.normal(k_w3, (hid2, C2), dtype=jnp.float32) * 0.1
    w4 = jax.random.normal(k_w4, (C2, hid2), dtype=jnp.float32) * 0.1

    out2 = jax.block_until_ready(se_layer(x2, w3, w4))
    ref2 = jax.block_until_ready(se_layer_ref(x2, w3, w4))
    assert jnp.allclose(out2, ref2, atol=1e-4, rtol=1e-4), "mismatch (config 2)"

    # Config 3: bf16 activations end-to-end (half the HBM traffic); compare
    # against the f32 reference of the same bf16 values with bf16 tolerance.
    x_bf16 = x.astype(jnp.bfloat16)
    out3 = jax.block_until_ready(se_layer(x_bf16, w1, w2))
    ref3 = se_layer_ref(x_bf16, w1, w2).astype(jnp.float32)
    assert out3.dtype == jnp.bfloat16
    assert jnp.allclose(out3.astype(jnp.float32), ref3, atol=5e-2, rtol=5e-2), \
        "mismatch (config 3, bf16)"

    print("KERNEL_OK")
</pallas_src>

<mosaic_0001>
module attributes {stable_mosaic.version = 11 : i64} {
  func.func @_se_kernel_chw(%arg0: i32, %arg1: memref<1x64x256xf32, #tpu.memory_space<vmem>>, %arg2: memref<64x4xf32, #tpu.memory_space<vmem>>, %arg3: memref<4x64xf32, #tpu.memory_space<vmem>>, %arg4: memref<1x64x256xf32, #tpu.memory_space<vmem>>) attributes {dimension_semantics = [#tpu.dimension_semantics<parallel>], iteration_bounds = array<i64: 4>, scalar_prefetch = 0 : i64, scratch_operands = 0 : i64, tpu.core_type = #tpu.core_type<tc>, window_params = [{transform_indices = @transform_0, window_bounds = array<i64: 1, 64, 256>}, {pipeline_mode = #tpu.pipeline_mode<synchronous>, transform_indices = @transform_1, window_bounds = array<i64: 64, 4>}, {pipeline_mode = #tpu.pipeline_mode<synchronous>, transform_indices = @transform_2, window_bounds = array<i64: 4, 64>}, {transform_indices = @transform_3, window_bounds = array<i64: 1, 64, 256>}]} {
    %c0 = arith.constant 0 : index
    %c0_0 = arith.constant 0 : index
    %c0_1 = arith.constant 0 : index
    %0 = vector.load %arg1[%c0, %c0_0, %c0_1] : memref<1x64x256xf32, #tpu.memory_space<vmem>>, vector<1x64x256xf32>
    %cst = arith.constant dense<0.000000e+00> : vector<1x64xf32>
    %1 = vector.multi_reduction <add>, %0, %cst [2] : vector<1x64x256xf32> to vector<1x64xf32>
    %cst_2 = arith.constant 2.560000e+02 : f32
    %2 = vector.broadcast %cst_2 : f32 to vector<1x64xf32>
    %3 = arith.divf %1, %2 : vector<1x64xf32>
    %c0_3 = arith.constant 0 : index
    %c0_4 = arith.constant 0 : index
    %4 = vector.load %arg2[%c0_3, %c0_4] : memref<64x4xf32, #tpu.memory_space<vmem>>, vector<64x4xf32>
    %cst_5 = arith.constant dense<0.000000e+00> : vector<1x4xf32>
    %5 = tpu.matmul %3, %4, %cst_5 {dimension_numbers = #tpu.dot_dimension_numbers<[1], [0], [0], [1], [0, 0, 1, 1], [], []>} : vector<1x64xf32>, vector<64x4xf32>, vector<1x4xf32> -> vector<1x4xf32>
    %cst_6 = arith.constant 0.000000e+00 : f32
    %6 = vector.broadcast %cst_6 : f32 to vector<1x4xf32>
    %7 = arith.maximumf %5, %6 : vector<1x4xf32>
    %c0_7 = arith.constant 0 : index
    %c0_8 = arith.constant 0 : index
    %8 = vector.load %arg3[%c0_7, %c0_8] : memref<4x64xf32, #tpu.memory_space<vmem>>, vector<4x64xf32>
    %cst_9 = arith.constant dense<0.000000e+00> : vector<1x64xf32>
    %9 = tpu.matmul %7, %8, %cst_9 {dimension_numbers = #tpu.dot_dimension_numbers<[1], [0], [0], [1], [0, 0, 1, 1], [], []>} : vector<1x4xf32>, vector<4x64xf32>, vector<1x64xf32> -> vector<1x64xf32>
    %10 = arith.negf %9 : vector<1x64xf32>
    %11 = math.exp %10 : vector<1x64xf32>
    %cst_10 = arith.constant 1.000000e+00 : f32
    %12 = vector.broadcast %cst_10 : f32 to vector<1x64xf32>
    %13 = arith.addf %12, %11 : vector<1x64xf32>
    %14 = arith.divf %12, %13 : vector<1x64xf32>
    %15 = vector.shape_cast %14 : vector<1x64xf32> to vector<1x64x1xf32>
    %16 = vector.broadcast %15 : vector<1x64x1xf32> to vector<1x64x256xf32>
    %17 = arith.mulf %0, %16 : vector<1x64x256xf32>
    %c0_11 = arith.constant 0 : index
    %c0_12 = arith.constant 0 : index
    %c0_13 = arith.constant 0 : index
    %18 = vector.load %arg4[%c0_11, %c0_12, %c0_13] : memref<1x64x256xf32, #tpu.memory_space<vmem>>, vector<1x64x256xf32>
    tpu.vector_store %arg4[%c0_11, %c0_12, %c0_13], %17 {strides = array<i32>} : memref<1x64x256xf32, #tpu.memory_space<vmem>>, vector<1x64x256xf32>,
    return
  }
  func.func @transform_0(%arg0: i32) -> (i32, i32, i32) {
    %c0_i32 = arith.constant 0 : i32
    %c0_i32_0 = arith.constant 0 : i32
    %c0_i32_1 = arith.constant 0 : i32
    return %arg0, %c0_i32, %c0_i32_0 : i32, i32, i32
  }
  func.func @transform_1(%arg0: i32) -> (i32, i32) {
    %c0_i32 = arith.constant 0 : i32
    %c0_i32_0 = arith.constant 0 : i32
    %c0_i32_1 = arith.constant 0 : i32
    return %c0_i32, %c0_i32_0 : i32, i32
  }
  func.func @transform_2(%arg0: i32) -> (i32, i32) {
    %c0_i32 = arith.constant 0 : i32
    %c0_i32_0 = arith.constant 0 : i32
    %c0_i32_1 = arith.constant 0 : i32
    return %c0_i32, %c0_i32_0 : i32, i32
  }
  func.func @transform_3(%arg0: i32) -> (i32, i32, i32) {
    %c0_i32 = arith.constant 0 : i32
    %c0_i32_0 = arith.constant 0 : i32
    %c0_i32_1 = arith.constant 0 : i32
    return %arg0, %c0_i32, %c0_i32_0 : i32, i32, i32
  }
}

</mosaic_0001>

<bundles_post_ra>
// kernel: tpu_custom_call.1
= control target key start
LH: loop header
LB: loop body
LE: loop exit
PB: predicated region body
PF: predicated region fallthrough
CT: control target
= control target key end

     0   :  { %8 = vsyncpa [#allocation3], 0  ;;  %s1159_s0 = inlined_call_operand.hbm [shape: f32[4,64,256], index: 0, kind: input, shape index: {}]   ;;  %s1160_s1 = inlined_call_operand.vmem [shape: f32[64,4], index: 1, kind: input, shape index: {}]   ;;  %s1161_s2 = inlined_call_operand.vmem [shape: f32[4,64], index: 2, kind: input, shape index: {}]   ;;  %s1162_s3 = inlined_call_operand.hbm [shape: f32[4,64,256], index: 3, kind: output, shape index: {}]  }
   0x1   :  { %10 = vsyncpa [#allocation3 + $0x1], 0 }
   0x2   :  { %11 = vsyncpa [#allocation4], 0 }
   0x3   :  { %13 = vsyncpa [#allocation4 + $0x1], 0  ;;  %s873_s12 = smov 0   ;;  %s875_s13 = smov 0  }
   0x4   :  { %s877_s14 = smov 0   ;;  %s879_s15 = smov 0  }
   0x5 LB: > { %s894_s16 = sadd.s32 4294967295, %s842_s15   ;;  %s622_s17 = sadd.s32 4294967294, %s842_s15   ;;  %s842_s15 = sphi %s879_s15, %s1174_s15   ;;  %s838_s14 = sphi %s877_s14, %s1173_s14   ;;  %s834_s13 = sphi %s875_s13, %s1172_s13   ;;  %s830_s12 = sphi %s873_s12, %s1171_s12  }
   0x6   : > { %s898_s18 = sadd.s32 1, %s842_s15   ;;  %s26_s19 = sadd.s32 1, %s838_s14 }
   0x7   : > { %s23_s20 = ssub.s32 %s842_s15, %s898_s18  ;;  %p33_p0 = scmp.ne.s32.totalorder %s838_s14, %s834_s13 }
   0x8   : > { %p24_p1 = scmp.eq.s32.totalorder %s23_s20, 0  ;;  %p34_p2 = scmp.eq.s32.totalorder %s842_s15, 0 }
   0x9   : > { %p39_p3 = scmp.ne.s32.totalorder %s834_s13, %s830_s12  ;;  %p40_p4 = scmp.eq.s32.totalorder %s894_s16, 0 }
   0xa   : > { %s910_s21 = scalar_select %p24_p1, %s838_s14, %s26_s19  }
   0xb   : > { %p912_p5 = por %p34_p2, %p33_p0  ;;  %p916_p6 = por %p40_p4, %p39_p3 }
   0xc   : > { %p105_p7 = scmp.eq.s32.totalorder %s894_s16, 3  ;;  %p111_p8 = scmp.eq.s32.totalorder %s622_s17, 3 }
   0xd   : > { %p701_p9 = scmp.lt.s32.totalorder %s842_s15, 4  ;;  %s137_s26 = sand.u32 1, %s838_s14  }
   0xe   : > { %p922_p10 = por %p105_p7, %p33_p0  ;;  %p926_p11 = por %p111_p8, %p39_p3 }
   0xf   : > { %s640_s27 = sshll.u32 %s842_s15, 11  ;;  %s625_s28 = sshll.u32 %s137_s26, 7 }
  0x10   : > { %s1166_s24 = scalar_select %p922_p10, 1, 0 }
  0x11   : > { %s1167_s25 = scalar_select %p926_p11, 1, 0 }
  0x12   : > { %s935_s4 = scalar_lea.hbm %s1159_s0, %s640_s27  ;;  %s141_s5 = scalar_lea.vmem [#allocation2], %s625_s28 }
  0x13   : > { %s148_s6 = sshll.u32 %s141_s5, 4  ;;  %p939_p12 = pnand %p701_p9, %p912_p5  ;;  %s943_s6 = int_to_ptr.vmem [resolvable:$true] %s148_s6 }
  0x14   : > { %s945_s8 = scalar_lea.sflag [#allocation3], %s137_s26  ;;  %s746_s9 = scalar_lea.hbm %s935_s4, 2048 }
  0x15   : > { %p747_p13 = scmp.ne.s32.totalorder %s935_s4, %s746_s9  ;;  %p748_p0 = pneg %p939_p12 }
  0x16   : > { %s751_s17 = scalar_lea.hbm %s1159_s0, 8192  ;;  %p752_p3 = scmp.lt.u32.totalorder %s935_s4, %s1159_s0 }
  0x17   : > { %p749_p1 = pnand %p748_p0, %p747_p13  ;;  %p753_p4 = scmp.lt.u32.totalorder %s751_s17, %s746_s9 }
  0x18   : > { %p755_p7 = scmp.lt.u32.totalorder %s746_s9, %s935_s4 }
  0x19   : > { %p750_p2 = pneg %p749_p1  ;;  %p754_p5 = por %p753_p4, %p752_p3 }
  0x1b   : > { %p756_p8 = por %p755_p7, %p754_p5 }
  0x1d   : > { %p757_p9 = pnand %p756_p8, %p750_p2 }
  0x1f   : > { %760 = shalt.err (!%p757_p9)
}
  0x20   : > { %s761_s22 = scalar_lea.vmem %s943_s6, 2048  ;;  %s844_s26 = smov [#allocation2]  }
  0x21   : > { %p762_p13 = scmp.ne.s32.totalorder %s943_s6, %s761_s22  ;;  %s766_s27 = sshll.u32 %s844_s26, 4  ;;  %s767_s27 = int_to_ptr.vmem [resolvable:$false] %s766_s27 }
  0x22   : > { %s768_s28 = scalar_lea.vmem %s767_s27, 4096  ;;  %p769_p10 = scmp.lt.s32.totalorder %s943_s6, %s767_s27 }
  0x23   : > { %p764_p1 = pnand %p762_p13, %p748_p0  ;;  %p770_p3 = scmp.lt.s32.totalorder %s768_s28, %s761_s22 }
  0x25   : > { %p765_p11 = pneg %p764_p1  ;;  %p771_p4 = por %p770_p3, %p769_p10 }
  0x27   : > { %p772_p5 = pnand %p771_p4, %p765_p11 }
  0x29   : > { %775 = shalt.err (!%p772_p5)
}
  0x2a   : > { %s845_s29 = smov 256   ;;  %s846_s30 = smov 16  }
  0x2b   : > { %696 = dma.hbm_to_vmem [thread:$0]  (!%p939_p12), %s935_s4, 2048, %s943_s6, %s945_s8, %s845_s29, %s845_s29, %s846_s30  }
  0x2c   : > { %p628_p0 = scmp.ge.s32.totalorder %s842_s15, 1  ;;  %p156_p2 = scmp.lt.s32.totalorder %s842_s15, 5 }
  0x2e   : > { %p157_p7 = pnand %p628_p0, %p156_p2 }
  0x2f   : > { %s976_s5 = sand.u32 (!%p157_p7), 1, %s834_s13  }
  0x30   : > { %160 = sbr.rel (%p157_p7) target bundleno = 821 (0x335), region = 32  ;;  %s629_s9 = sshll.u32 (!%p157_p7), %s976_s5, 7 }
  0x31   : > { %s163_s10 = scalar_lea.sflag (!%p157_p7), [#allocation3], %s976_s5  ;;  %s166_s11 = scalar_lea.vmem (!%p157_p7), [#allocation2], %s629_s9 }
  0x37   : > { %821 = dma.done.wait (%p916_p6), %s163_s10, 2048  }
  0x38   : > { %823 = vsyncadd (%p916_p6), %s163_s10, 4294965248  ;;  %v986_v0 = vld [vmem:[%s166_s11] sm:$0xff]  ;;  %v988_v1 = vld [vmem:[%s166_s11 + $0x8] sm:$0xff]  ;;  %v847_v27 = vmov 0.0|0.0   ;;  %vm848_vm0 = vmmov 0   ;;  %v849_v37 = vmov 0.0   ;;  %v254_v38 = vlaneseq }
  0x39   : > { %v990_v2 = vld [vmem:[%s166_s11 + $0x20] sm:$0xff]  ;;  %v205_v3 = vadd.f32 %v988_v1, %v986_v0  ;;  %v994_v4 = vld [vmem:[%s166_s11 + $0x28] sm:$0xff]  ;;  %v996_v5 = vld [vmem:[%s166_s11 + $0x10] sm:$0xff]  ;;  %677 = vmatprep.subr.bf16.mxu0 %v847_v27  ;;  %669 = vmatprep.mubr.msk.f32.mxu0 %vm848_vm0, %v849_v37  ;;  %vm265_vm1 = vcmask 130112   ;;  %vm272_vm2 = vcmask 195712   ;;  %vm279_vm3 = vcmask 261312  }
  0x3a   : > { %v998_v6 = vld [vmem:[%s166_s11 + $0x18] sm:$0xff]  ;;  %v211_v7 = vadd.f32 %v994_v4, %v990_v2  ;;  %v1002_v8 = vld [vmem:[%s166_s11 + $0x30] sm:$0xff]  ;;  %v1010_v12 = vld [vmem:[%s166_s11 + $0x40] sm:$0xff]  ;;  %672 = vmatprep.subr.mxu1 %v849_v37  ;;  %674 = vmatprep.mubr.msk.f32.mxu1 %vm848_vm0, %v849_v37  ;;  %v255_v39 = vand.u32 127, %v254_v38  ;;  %v1058_v40 = vshrl.u32 %v254_v38, 7  ;;  %vm286_vm4 = vcmask 326912  }
  0x3b   : > { %v1004_v9 = vld [vmem:[%s166_s11 + $0x38] sm:$0xff]  ;;  %206 = vadd.xlane.f32.xlu0 %v205_v3  ;;  %v208_v10 = vadd.f32 %v998_v6, %v996_v5  ;;  %v1012_v13 = vld [vmem:[%s166_s11 + $0x48] sm:$0xff]  ;;  %v1014_v14 = vld [vmem:[%s166_s11 + $0x50] sm:$0xff]  ;;  %vm293_vm5 = vcmask 392512   ;;  %vm300_vm6 = vcmask 458112   ;;  %vm307_vm7 = vcmask 523712  }
  0x3c   : > { %212 = vadd.xlane.f32.xlu1 %v211_v7  ;;  %v214_v11 = vadd.f32 %v1004_v9, %v1002_v8  ;;  %v1016_v15 = vld [vmem:[%s166_s11 + $0x58] sm:$0xff]  ;;  %v217_v16 = vadd.f32 %v1012_v13, %v1010_v12  ;;  %v1022_v18 = vld [vmem:[%s166_s11 + $0x60] sm:$0xff]  ;;  %v1024_v19 = vld [vmem:[%s166_s11 + $0x68] sm:$0xff]  ;;  %v260_v41 = vadd.s32 4294967288, %v255_v39  ;;  %v267_v43 = vadd.s32 4294967280, %v255_v39  ;;  %s1079_s6 = scalar_lea.vmem [#allocation5], %s629_s9 }
  0x3d   : > { %v220_v17 = vadd.f32 %v1016_v15, %v1014_v14  ;;  %v1026_v20 = vld [vmem:[%s166_s11 + $0x70] sm:$0xff]  ;;  %v1028_v21 = vld [vmem:[%s166_s11 + $0x78] sm:$0xff]  ;;  %v223_v22 = vadd.f32 %v1024_v19, %v1022_v18  ;;  %v238_v24 = vld [vmem:[%s1160_s1] sm:$0xff]  ;;  %v274_v44 = vadd.s32 4294967272, %v255_v39  ;;  %v258_v46 = vsub.s32 %v255_v39, %v1058_v40  ;;  %s641_s9 = sshll.u32 %s894_s16, 11  ;;  %s549_s7 = sshll.u32 %s1079_s6, 4  ;;  %s1112_s7 = int_to_ptr.vmem [resolvable:$true] %s549_s7 }
  0x3e   : > { %v226_v23 = vadd.f32 %v1028_v21, %v1026_v20  ;;  %v239_v25 = vld [vmem:[%s1160_s1 + $0x8] sm:$0xff]  ;;  %v240_v28 = vld [vmem:[%s1160_s1 + $0x10] sm:$0xff]  ;;  %v241_v29 = vld [vmem:[%s1160_s1 + $0x18] sm:$0xff]  ;;  %v263_v48 = vsub.s32 %v260_v41, %v1058_v40  ;;  %v281_v49 = vadd.s32 4294967264, %v255_v39  ;;  %v270_v50 = vsub.s32 %v267_v43, %v1058_v40  ;;  %s1110_s19 = scalar_lea.hbm %s1162_s3, %s641_s9  ;;  %s536_s16 = scalar_lea.sflag [#allocation4], %s976_s5 }
  0x3f   : > { %209 = vadd.xlane.f32.xlu0 %v208_v10  ;;  %v678_v26 = vpack.c.bf16 %v239_v25, %v238_v24  ;;  %v681_v30 = vpack.c.bf16 %v241_v29, %v240_v28  ;;  %v242_v31 = vld [vmem:[%s1160_s1 + $0x20] sm:$0xff]  ;;  %v243_v32 = vld [vmem:[%s1160_s1 + $0x28] sm:$0xff]  ;;  %v244_v34 = vld [vmem:[%s1160_s1 + $0x30] sm:$0xff]  ;;  %v277_v53 = vsub.s32 %v274_v44, %v1058_v40  ;;  %v288_v54 = vadd.s32 4294967256, %v255_v39  ;;  %s776_s20 = scalar_lea.vmem %s1112_s7, 2048  ;;  %p1169_p10 = scmp.ne.s32.totalorder %s1166_s24, 0 }
  0x40   : > { %215 = vadd.xlane.f32.xlu1 %v214_v11  ;;  %v684_v33 = vpack.c.bf16 %v243_v32, %v242_v31  ;;  %v245_v35 = vld [vmem:[%s1160_s1 + $0x38] sm:$0xff]  ;;  %v284_v60 = vsub.s32 %v281_v49, %v1058_v40  ;;  %v295_v61 = vadd.s32 4294967248, %v255_v39  ;;  %v302_v10 = vadd.s32 4294967240, %v255_v39  ;;  %v383_v39 = vld [vmem:[%s1161_s2] sm:$0xf]  ;;  %p777_p6 = scmp.ne.s32.totalorder %s1112_s7, %s776_s20  ;;  %s850_s22 = smov [#allocation5]  }
  0x41   : > { %679 = vmatpush3.bf16.msra.mxu0 %v678_v26  ;;  %v687_v36 = vpack.c.bf16 %v245_v35, %v244_v34  ;;  %v291_v7 = vsub.s32 %v288_v54, %v1058_v40  ;;  %vm309_vm8 = vcmask 523264   ;;  %vm388_vm9 = vcmask 1043456   ;;  %s780_s26 = sshll.u32 %s850_s22, 4  ;;  %s781_s26 = int_to_ptr.vmem [resolvable:$false] %s780_s26 }
  0x42   : > { %680 = vmatprep.subr.bf16.mxu0 %v847_v27  ;;  %v298_v26 = vsub.s32 %v295_v61, %v1058_v40  ;;  %v305_v29 = vsub.s32 %v302_v10, %v1058_v40  ;;  %673 = vmatpush3.msk.msra.mxu1 %vm388_vm9, %v383_v39  ;;  %vm384_vm10 = vcmask 31744   ;;  %v470_v49 = vsub.s32 0, %v1058_v40  ;;  %p778_p11 = pnand %p777_p6, %p1169_p10  ;;  %s782_s27 = scalar_lea.vmem %s781_s26, 4096 }
  0x43   : > { %218 = vadd.xlane.f32.xlu0 %v217_v16  ;;  %p783_p8 = scmp.lt.s32.totalorder %s1112_s7, %s781_s26  ;;  %p784_p9 = scmp.lt.s32.totalorder %s782_s27, %s776_s20 }
  0x44   : > { %221 = vadd.xlane.f32.xlu1 %v220_v17  ;;  %p779_p12 = pneg %p778_p11 }
  0x45   : > { %682 = vmatpush3.bf16.msra.mxu0 %v681_v30  ;;  %p785_p13 = por %p784_p9, %p783_p8 }
  0x46   : > { %683 = vmatprep.subr.bf16.mxu0 %v847_v27 }
  0x47   : > { %224 = vadd.xlane.f32.xlu0 %v223_v22  ;;  %p786_p1 = pnand %p785_p13, %p779_p12 }
  0x48   : > { %227 = vadd.xlane.f32.xlu1 %v226_v23 }
  0x49   : > { %685 = vmatpush3.bf16.msra.mxu0 %v684_v33 }
  0x4a   : > { %686 = vmatprep.subr.bf16.mxu0 %v847_v27 }
  0x4d   : > { %688 = vmatpush3.bf16.msra.mxu0 %v687_v36 }
  0xc8   : > { %v207_v42 = vpop.xlane.xlu0 %206 }
  0xc9   : > { %v213_v45 = vpop.xlane.xlu1 %212  ;;  %v230_v47 = vmul.f32 0.00390625, %v207_v42 }
  0xca   : > { %v232_v51 = vmul.f32 0.00390625, %v213_v45 }
  0xcb   : > { %v259_v58 = vrot.slane %v230_v47, %v258_v46 }
  0xcc   : > { %v210_v52 = vpop.xlane.xlu0 %209  ;;  %v271_v62 = vrot.slane %v232_v51, %v270_v50 }
  0xcd   : > { %v231_v55 = vmul.f32 0.00390625, %v210_v52  ;;  %v216_v56 = vpop.xlane.xlu1 %215 }
  0xce   : > { %v233_v57 = vmul.f32 0.00390625, %v216_v56 }
  0xcf   : > { %v264_v59 = vrot.slane %v231_v55, %v263_v48 }
  0xd0   : > { %v278_v63 = vrot.slane %v233_v57, %v277_v53  ;;  %v219_v3 = vpop.xlane.xlu0 %218 }
  0xd1   : > { %v266_v11 = vsel %vm265_vm1, %v264_v59, %v259_v58  ;;  %v234_v16 = vmul.f32 0.00390625, %v219_v3  ;;  %v222_v17 = vpop.xlane.xlu1 %221 }
  0xd2   : > { %v273_v22 = vsel %vm272_vm2, %v271_v62, %v266_v11  ;;  %v235_v23 = vmul.f32 0.00390625, %v222_v17 }
  0xd3   : > { %v280_v24 = vsel %vm279_vm3, %v278_v63, %v273_v22  ;;  %v285_v25 = vrot.slane %v234_v16, %v284_v60 }
  0xd4   : > { %v292_v27 = vrot.slane %v235_v23, %v291_v7  ;;  %v225_v28 = vpop.xlane.xlu0 %224 }
  0xd5   : > { %v287_v30 = vsel %vm286_vm4, %v285_v25, %v280_v24  ;;  %v236_v31 = vmul.f32 0.00390625, %v225_v28  ;;  %v228_v32 = vpop.xlane.xlu1 %227 }
  0xd6   : > { %v237_v33 = vmul.f32 0.00390625, %v228_v32  ;;  %v294_v35 = vsel %vm293_vm5, %v292_v27, %v287_v30 }
  0xd7   : > { %v299_v34 = vrot.slane %v236_v31, %v298_v26 }
  0xd8   : > { %v306_v36 = vrot.slane %v237_v33, %v305_v29 }
  0xd9   : > { %v301_v37 = vsel %vm300_vm6, %v299_v34, %v294_v35 }
  0xda   : > { %v308_v38 = vsel %vm307_vm7, %v306_v36, %v301_v37 }
  0xdb   : > { %670 = vmatmul.mubr.msk.f32.vlgmr.msra.gmra.mrb[0].mxu0 %vm309_vm8, %v308_v38 }
 0x1ae   : > { %v378_v41 = vpop.f32.mrb[0].mxu0 }
 0x1af   : > { %v382_v42 = vmax.f32 %v378_v41, 0.0  ;;  %v671_v43 = vpop.f32.mrb[1].mxu0 }
 0x1b1   : > { %675 = vmatmul.mubr.msk.f32.vlgmr.msra.gmra.mrb[0].mxu1 %vm384_vm10, %v382_v42 }
 0x284   : > { %v458_v44 = vpop.f32.mrb[0].mxu1 }
 0x285   : > { %v634_v45 = vmul.f32 -1.442695, %v458_v44  ;;  %v676_v46 = vpop.f32.mrb[1].mxu1 }
 0x287   : > { %742 = vpow2.f32 %v634_v45 }
 0x291   : > { %v743_v47 = vpop.eup %742 }
 0x292   : > { %v465_v48 = vadd.f32 1.0, %v743_v47 }
 0x294   : > { %744 = vrcp.f32 %v465_v48 }
 0x29e   : > { %v745_v50 = vpop.eup %744 }
 0x29f   : > { %v471_v51 = vrot.slane %v745_v50, %v470_v49 }
 0x2a1   : > { %477 = vbcast.lane.b32.xlu1 %v471_v51, 264  ;;  %473 = vbcast.lane.b32.xlu0 %v471_v51, 256 }
 0x2a5   : > { %481 = vbcast.lane.b32.xlu1 %v471_v51, 272  ;;  %489 = vbcast.lane.b32.xlu0 %v471_v51, 288 }
 0x2a9   : > { %485 = vbcast.lane.b32.xlu1 %v471_v51, 280  ;;  %497 = vbcast.lane.b32.xlu0 %v471_v51, 304 }
 0x2ad   : > { %493 = vbcast.lane.b32.xlu1 %v471_v51, 296 }
 0x2b1   : > { %501 = vbcast.lane.b32.xlu1 %v471_v51, 312 }
 0x313   : > { %v478_v52 = vpop.permute.xlu1 %477  ;;  %v474_v53 = vpop.permute.xlu0 %473 }
 0x314   : > { %v505_v54 = vmul.f32 %v478_v52, %v996_v5  ;;  %v506_v55 = vmul.f32 %v478_v52, %v998_v6  ;;  %v503_v56 = vmul.f32 %v474_v53, %v986_v0  ;;  %v504_v40 = vmul.f32 %v474_v53, %v988_v1 }
 0x316   : > { %521 = vst [vmem:[%s1079_s6 + $0x10] sm:$0xff] %v505_v54  ;;  %522 = vst [vmem:[%s1079_s6 + $0x18] sm:$0xff] %v506_v55 }
 0x317   : > { %519 = vst [vmem:[%s1079_s6] sm:$0xff] %v503_v56  ;;  %520 = vst [vmem:[%s1079_s6 + $0x8] sm:$0xff] %v504_v40  ;;  %v482_v5 = vpop.permute.xlu1 %481  ;;  %v490_v0 = vpop.permute.xlu0 %489 }
 0x318   : > { %v507_v1 = vmul.f32 %v482_v5, %v990_v2  ;;  %v508_v6 = vmul.f32 %v482_v5, %v994_v4  ;;  %v511_v57 = vmul.f32 %v490_v0, %v1010_v12  ;;  %v512_v58 = vmul.f32 %v490_v0, %v1012_v13 }
 0x31a   : > { %523 = vst [vmem:[%s1079_s6 + $0x20] sm:$0xff] %v507_v1  ;;  %524 = vst [vmem:[%s1079_s6 + $0x28] sm:$0xff] %v508_v6 }
 0x31b   : > { %527 = vst [vmem:[%s1079_s6 + $0x40] sm:$0xff] %v511_v57  ;;  %528 = vst [vmem:[%s1079_s6 + $0x48] sm:$0xff] %v512_v58  ;;  %v486_v59 = vpop.permute.xlu1 %485  ;;  %v498_v60 = vpop.permute.xlu0 %497 }
 0x31c   : > { %v509_v2 = vmul.f32 %v486_v59, %v1002_v8  ;;  %v510_v61 = vmul.f32 %v486_v59, %v1004_v9  ;;  %v515_v4 = vmul.f32 %v498_v60, %v1022_v18  ;;  %v516_v12 = vmul.f32 %v498_v60, %v1024_v19 }
 0x31e   : > { %525 = vst [vmem:[%s1079_s6 + $0x30] sm:$0xff] %v509_v2  ;;  %526 = vst [vmem:[%s1079_s6 + $0x38] sm:$0xff] %v510_v61 }
 0x31f   : > { %531 = vst [vmem:[%s1079_s6 + $0x60] sm:$0xff] %v515_v4  ;;  %532 = vst [vmem:[%s1079_s6 + $0x68] sm:$0xff] %v516_v12  ;;  %v494_v13 = vpop.permute.xlu1 %493 }
 0x320   : > { %v513_v62 = vmul.f32 %v494_v13, %v1014_v14  ;;  %v514_v63 = vmul.f32 %v494_v13, %v1016_v15 }
 0x322   : > { %529 = vst [vmem:[%s1079_s6 + $0x50] sm:$0xff] %v513_v62  ;;  %530 = vst [vmem:[%s1079_s6 + $0x58] sm:$0xff] %v514_v63 }
 0x323   : > { %v502_v8 = vpop.permute.xlu1 %501 }
 0x324   : > { %v517_v9 = vmul.f32 %v502_v8, %v1026_v20  ;;  %v518_v14 = vmul.f32 %v502_v8, %v1028_v21 }
 0x326   : > { %533 = vst [vmem:[%s1079_s6 + $0x70] sm:$0xff] %v517_v9  ;;  %534 = vst [vmem:[%s1079_s6 + $0x78] sm:$0xff] %v518_v14 }
 0x327   : > { %789 = shalt.err (!%p786_p1)
}
 0x328   : > { %s790_s28 = scalar_lea.hbm %s1110_s19, 2048  ;;  %s794_s10 = scalar_lea.hbm %s1162_s3, 8192 }
 0x329   : > { %p791_p3 = scmp.ne.s32.totalorder %s1110_s19, %s790_s28  ;;  %p795_p0 = scmp.lt.u32.totalorder %s1110_s19, %s1162_s3 }
 0x32a   : > { %p796_p2 = scmp.lt.u32.totalorder %s794_s10, %s790_s28  ;;  %p798_p6 = scmp.lt.u32.totalorder %s790_s28, %s1110_s19 }
 0x32b   : > { %p792_p4 = pnand %p791_p3, %p1169_p10 }
 0x32c   : > { %p797_p7 = por %p796_p2, %p795_p0 }
 0x32d   : > { %p793_p5 = pneg %p792_p4 }
 0x32e   : > { %p799_p11 = por %p798_p6, %p797_p7 }
 0x330   : > { %p800_p12 = pnand %p799_p11, %p793_p5 }
 0x332   : > { %803 = shalt.err (!%p800_p12)
}
 0x333   : > { %s851_s4 = smov 256   ;;  %s852_s6 = smov 16  }
 0x334   : > { %691 = dma.vmem_to_hbm [thread:$0]  (%p1169_p10), %s1112_s7, 2048, %s1110_s19, %s536_s16, %s851_s4, %s851_s4, %s852_s6  }
 0x335 PF: > { %p702_p8 = scmp.ge.s32.totalorder %s842_s15, 2  ;;  %s564_s9 = sand.u32 1, %s830_s12  }
 0x336   : > { %p1170_p9 = scmp.ne.s32.totalorder %s1167_s25, 0  ;;  %s565_s8 = scalar_lea.sflag [#allocation4], %s564_s9 }
 0x338   : > { %p698_p13 = pnand %p702_p8, %p1170_p9 }
 0x33a   : > { %825 = dma.done.wait (!%p698_p13), %s565_s8, 2048  }
 0x33b   : > { %827 = vsyncadd (!%p698_p13), %s565_s8, 4294965248  ;;  %p16_p1 = scmp.ge.s32.totalorder %s898_s18, 6   ;;  %s1171_s12 = smov %s834_s13 }
 0x33c   : > { %s1172_s13 = smov %s838_s14  ;;  %s1173_s14 = smov %s910_s21 }
 0x33d   : > { %s1174_s15 = smov %s898_s18  ;;  %18 = sbr.rel (!%p16_p1) target bundleno = 5 (0x5), region = 77 }
 0x344   :  { %570 = vsyncpa [#allocation3], 1 }
 0x345   :  { %572 = vsyncpa [#allocation3 + $0x1], 1 }
 0x346   :  { %573 = vsyncpa [#allocation4], 1 }
 0x347   :  { %575 = vsyncpa [#allocation4 + $0x1], 1 }

</bundles_post_ra>
